<compile_context>
chip_gen: v5e
topology: v5e:2x2
jax: 0.10.0
libtpu: 0.0.40
codegen_flags: <defaults>
</compile_context>

<pallas_src>
import jax
import jax.numpy as jnp
from jax.experimental import pallas as pl
from jax.experimental.pallas import tpu as pltpu


def scaling_kernel(x_ref, shift_ref, inv_ref, o_ref):
    # x_ref / o_ref: (row_block, col_block) tiles
    # shift_ref / inv_ref: (row_block, 1) f32 per-row constants (lane broadcast)
    x = x_ref[...]
    o_ref[...] = ((x - shift_ref[...]) * inv_ref[...]).astype(o_ref.dtype)


def _target_bytes() -> int:
    """Per-buffer tile budget, generation-aware (conservative default)."""
    try:
        kind = jax.devices()[0].device_kind.lower()
    except Exception:  # pragma: no cover - defensive
        return 2 << 20
    if "v6" in kind:
        return 4 << 20          # v6e: 32 MiB scoped default, 4 bufs x 4 MiB = 16 MiB
    if "7" in kind:
        return 6 << 20          # v7x: 32 MiB scoped default, 4 bufs x 6 MiB = 24 MiB
    return 2 << 20              # v5e (16 MiB scoped default) and everything else


def _block_dims(rows, cols, itemsize, target_bytes):
    """Pick a lane-dense block ~target_bytes per buffer.

    col_block is always a multiple of 128 (capped at 2048) unless the whole
    array is narrower than 128 lanes; it does NOT need to divide cols — the
    boundary block is a partial/masked tile handled by the cdiv grid.
    """
    sub = max(8, 32 // max(1, itemsize))  # sublane multiple: f32->8, bf16->16, i8->32

    if cols < 128:
        col_block = cols                             # full extent (legal block)
    elif cols % 128 == 0:
        col_block = min(cols, 2048)
    else:
        col_block = min((cols // 128) * 128, 2048)   # round down; boundary masked

    max_rows = max(sub, target_bytes // (col_block * itemsize))
    if rows <= max_rows:
        row_block = rows                              # full extent (legal block)
    else:
        row_block = max(sub, (max_rows // sub) * sub)
    return row_block, col_block


def scaling_layer(inp: jax.Array) -> jax.Array:
    """Applies (inp - shift) / scale per channel. inp is NCHW with C == 3."""
    n, c, h, w = inp.shape
    assert c == 3, "ScalingLayer is defined for 3 input channels"
    dtype = inp.dtype
    itemsize = jnp.dtype(dtype).itemsize
    sub = max(8, 32 // max(1, itemsize))

    shift = jnp.array([-0.030, -0.088, -0.188], dtype=jnp.float32)
    scale = jnp.array([0.458, 0.448, 0.450], dtype=jnp.float32)
    inv_scale = 1.0 / scale  # exact host-side f32 reciprocal (kept in f32)

    # Choose the flat 2-D view.  Default: (N*C, H*W) -> big lane axis.
    # Small-batch fix-up: if N*C underfills the sublanes and W is lane-aligned,
    # use (N*C*H, W) instead so every vreg sublane carries data.
    if n * c < sub and w % 128 == 0 and w >= 128:
        rows, cols = n * c * h, w
        x2d = inp.reshape(rows, cols)
        shift_rows = jnp.repeat(jnp.tile(shift, n), h).reshape(rows, 1)
        inv_rows = jnp.repeat(jnp.tile(inv_scale, n), h).reshape(rows, 1)
    else:
        rows, cols = n * c, h * w
        x2d = inp.reshape(rows, cols)
        shift_rows = jnp.tile(shift, n).reshape(rows, 1)
        inv_rows = jnp.tile(inv_scale, n).reshape(rows, 1)

    row_block, col_block = _block_dims(rows, cols, itemsize, _target_bytes())
    grid = (pl.cdiv(rows, row_block), pl.cdiv(cols, col_block))

    out2d = pl.pallas_call(
        scaling_kernel,
        out_shape=jax.ShapeDtypeStruct((rows, cols), dtype),
        grid=grid,
        in_specs=[
            pl.BlockSpec((row_block, col_block), lambda i, j: (i, j)),
            pl.BlockSpec((row_block, 1), lambda i, j: (i, 0)),
            pl.BlockSpec((row_block, 1), lambda i, j: (i, 0)),
        ],
        out_specs=pl.BlockSpec((row_block, col_block), lambda i, j: (i, j)),
        compiler_params=pltpu.CompilerParams(
            dimension_semantics=("parallel", "parallel"),
        ),
    )(x2d, shift_rows, inv_rows)

    return out2d.reshape(n, c, h, w)


if __name__ == "__main__":
    key = jax.random.PRNGKey(0)
    x = jax.random.normal(key, (2, 3, 16, 16), dtype=jnp.float32)

    out = jax.block_until_ready(scaling_layer(x))

    # Reference check in plain JAX (same semantics as the PyTorch module).
    shift = jnp.array([-0.030, -0.088, -0.188], dtype=jnp.float32)[None, :, None, None]
    scale = jnp.array([0.458, 0.448, 0.450], dtype=jnp.float32)[None, :, None, None]
    ref = (x - shift) / scale
    assert out.shape == x.shape
    assert jnp.allclose(out, ref, atol=1e-6, rtol=1e-6), float(
        jnp.max(jnp.abs(out - ref))
    )

    print("KERNEL_OK")
</pallas_src>

<mosaic_0001>
module attributes {stable_mosaic.version = 11 : i64} {
  func.func @scaling_kernel(%arg0: i32, %arg1: i32, %arg2: memref<6x256xf32, #tpu.memory_space<vmem>>, %arg3: memref<6x1xf32, #tpu.memory_space<vmem>>, %arg4: memref<6x1xf32, #tpu.memory_space<vmem>>, %arg5: memref<6x256xf32, #tpu.memory_space<vmem>>) attributes {dimension_semantics = [#tpu.dimension_semantics<parallel>, #tpu.dimension_semantics<parallel>], iteration_bounds = array<i64: 1, 1>, scalar_prefetch = 0 : i64, scratch_operands = 0 : i64, tpu.core_type = #tpu.core_type<tc>, window_params = [{transform_indices = @transform_0, window_bounds = array<i64: 6, 256>}, {transform_indices = @transform_1, window_bounds = array<i64: 6, 1>}, {transform_indices = @transform_2, window_bounds = array<i64: 6, 1>}, {transform_indices = @transform_3, window_bounds = array<i64: 6, 256>}]} {
    %c0 = arith.constant 0 : index
    %c0_0 = arith.constant 0 : index
    %0 = vector.load %arg2[%c0, %c0_0] : memref<6x256xf32, #tpu.memory_space<vmem>>, vector<6x256xf32>
    %c0_1 = arith.constant 0 : index
    %c0_2 = arith.constant 0 : index
    %1 = vector.load %arg3[%c0_1, %c0_2] : memref<6x1xf32, #tpu.memory_space<vmem>>, vector<6x1xf32>
    %2 = vector.broadcast %1 : vector<6x1xf32> to vector<6x256xf32>
    %3 = arith.subf %0, %2 : vector<6x256xf32>
    %c0_3 = arith.constant 0 : index
    %c0_4 = arith.constant 0 : index
    %4 = vector.load %arg4[%c0_3, %c0_4] : memref<6x1xf32, #tpu.memory_space<vmem>>, vector<6x1xf32>
    %5 = vector.broadcast %4 : vector<6x1xf32> to vector<6x256xf32>
    %6 = arith.mulf %3, %5 : vector<6x256xf32>
    %c0_5 = arith.constant 0 : index
    %c0_6 = arith.constant 0 : index
    %7 = vector.load %arg5[%c0_5, %c0_6] : memref<6x256xf32, #tpu.memory_space<vmem>>, vector<6x256xf32>
    tpu.vector_store %arg5[%c0_5, %c0_6], %6 {strides = array<i32>} : memref<6x256xf32, #tpu.memory_space<vmem>>, vector<6x256xf32>,
    return
  }
  func.func @transform_0(%arg0: i32, %arg1: i32) -> (i32, i32) {
    %c0_i32 = arith.constant 0 : i32
    return %arg0, %arg1 : i32, i32
  }
  func.func @transform_1(%arg0: i32, %arg1: i32) -> (i32, i32) {
    %c0_i32 = arith.constant 0 : i32
    %c0_i32_0 = arith.constant 0 : i32
    return %arg0, %c0_i32 : i32, i32
  }
  func.func @transform_2(%arg0: i32, %arg1: i32) -> (i32, i32) {
    %c0_i32 = arith.constant 0 : i32
    %c0_i32_0 = arith.constant 0 : i32
    return %arg0, %c0_i32 : i32, i32
  }
  func.func @transform_3(%arg0: i32, %arg1: i32) -> (i32, i32) {
    %c0_i32 = arith.constant 0 : i32
    return %arg0, %arg1 : i32, i32
  }
}

</mosaic_0001>

<bundles_post_ra>
// kernel: tpu_custom_call.1
= control target key start
LH: loop header
LB: loop body
LE: loop exit
PB: predicated region body
PF: predicated region fallthrough
CT: control target
= control target key end

     0   :  { %v80_v1 = vmov 0   ;;  %s117_s0 = inlined_call_operand.vmem [shape: f32[6,256], index: 0, kind: input, shape index: {}]   ;;  %s118_s1 = inlined_call_operand.vmem [shape: f32[6,1], index: 1, kind: input, shape index: {}]   ;;  %s119_s2 = inlined_call_operand.vmem [shape: f32[6,1], index: 2, kind: input, shape index: {}]   ;;  %s120_s3 = inlined_call_operand.hbm [shape: f32[6,256], index: 3, kind: output, shape index: {}]  }
   0x1   :  { %v17_v0 = vld [vmem:[%s118_s1] sm:$0x3f]  ;;  %53 = vset.pattern.permute.xlu0 %v80_v1 }
   0x2   :  { %8 = vsyncpa [#allocation3], 0  ;;  %20 = vperm.xlu0 %53, %v17_v0   ;;  %v25_v2 = vld [vmem:[%s119_s2] sm:$0x3f]  ;;  %v16_v5 = vld [vmem:[%s117_s0 + $0x8] sm:$0x3f] }
   0x3   :  { %v15_v4 = vld [vmem:[%s117_s0] sm:$0x3f]  ;;  %s81_s1 = smov [#allocation2]   ;;  %s42_s23 = sshll.u32 %s120_s3, 4  ;;  %s43_s23 = int_to_ptr.hbm [resolvable:$true] %s42_s23 }
   0x4   :  { %s40_s20 = sshll.u32 %s81_s1, 4  ;;  %s41_s20 = int_to_ptr.vmem [resolvable:$true] %s40_s20 }
   0xa   :  { %28 = vperm.xlu0 %53, %v25_v2  }
  0x74   :  { %v21_v3 = vpop.permute.xlu0 %20 }
  0x75   :  { %v23_v6 = vsub.f32 %v15_v4, %v21_v3  ;;  %v24_v7 = vsub.f32 %v16_v5, %v21_v3 }
  0x7c   :  { %v29_v8 = vpop.permute.xlu0 %28 }
  0x7d   :  { %v31_v9 = vmul.f32 %v29_v8, %v23_v6  ;;  %v32_v10 = vmul.f32 %v29_v8, %v24_v7 }
  0x7f   :  { %33 = vst [vmem:[#allocation2] sm:$0x3f] %v31_v9 }
  0x80   :  { %34 = vst [vmem:[#allocation2 + $0x8] sm:$0x3f] %v32_v10 }
  0x81   :  { %45 = dma.vmem_to_hbm [thread:$0]  %s41_s20, 256, %s43_s23, [#allocation3]  }
  0x82   :  { %78 = dma.done.wait [#allocation3], 256  }
  0x83   :  { %79 = vsyncadd [#allocation3], 4294967040 }
  0x84   :  { %50 = vsyncpa [#allocation3], 1 }

</bundles_post_ra>
